<compile_context>
chip_gen: v7x
topology: tpu7x:2x2x1
jax: 0.10.0
libtpu: 0.0.40
codegen_flags: <defaults>
</compile_context>

<pallas_src>
import math
import functools

import numpy as np

import jax
import jax.numpy as jnp
from jax.experimental import pallas as pl
from jax.experimental.pallas import tpu as pltpu


def _round_up(x, m):
    return ((x + m - 1) // m) * m


# ----------------------------------------------------------------------------
# Pallas kernels
# ----------------------------------------------------------------------------
def _stft_frames_matmul_kernel(sig_ref, basis_ref, out_ref, *,
                               tile_t, span_rows, n_shifts):
    """Build frames in-kernel and multiply by the window-folded DFT basis.

    sig_ref  : (R_pad, hop)  f32   hop-sized rows of the reflect-padded signal
    basis_ref: (n_fft, F_pad) bf16 window-folded, re/im interleaved, zero-padded
    out_ref  : (tile_t, F_pad) f32
    """
    j = pl.program_id(1)
    start = pl.multiple_of(j * tile_t, 8)
    # Aligned span of rows covering frames [j*tile_t, j*tile_t + tile_t).
    span = sig_ref[pl.ds(start, span_rows), :]                 # (span_rows, hop)
    # frame i = rows i .. i+n_shifts-1 concatenated along lanes.
    frames = jnp.concatenate(
        [span[c:c + tile_t, :] for c in range(n_shifts)], axis=1)  # (tile_t, n_fft)
    out_ref[...] = jnp.dot(frames.astype(basis_ref.dtype), basis_ref[...],
                           preferred_element_type=jnp.float32)


def _speech_mask_kernel(slen_ref, out_ref):
    """out[b, t] = 1.0 if t < spectra_length[b] else 0.0.

    slen_ref: (B, 1) int32 ; out_ref: (B, T_lanes) f32 (lane-dense, single step)
    """
    t_idx = jax.lax.broadcasted_iota(jnp.int32, out_ref.shape, 1)
    out_ref[...] = (t_idx < slen_ref[...]).astype(out_ref.dtype)


# ----------------------------------------------------------------------------
# Wrappers
# ----------------------------------------------------------------------------
def stft_pallas(y, *, n_fft, hop_length, basis, f_bins, tile_t=256):
    """torch.view_as_real(torch.stft(y, n_fft, hop, win_length=n_fft,
    window=hann, center=True, pad_mode='reflect', onesided=True,
    return_complex=True)) -> [B, F, T, 2].

    The analysis window is already folded into `basis` (bf16, re/im
    interleaved, lane-padded to a multiple of 128).
    """
    assert y.ndim == 2
    B, t = y.shape
    pad = n_fft // 2
    assert t > pad, "reflect padding requires t > n_fft // 2"
    n_shifts = n_fft // hop_length
    assert n_shifts * hop_length == n_fft, "hop_length must divide n_fft"
    f_pad = basis.shape[1]

    T = 1 + t // hop_length                      # number of frames

    # ---- tiling over the frame axis ----
    tile_t = min(tile_t, _round_up(T, 8))
    tile_t = _round_up(tile_t, 8)
    num_t_tiles = -(-T // tile_t)
    T_pad = num_t_tiles * tile_t
    span_rows = _round_up(tile_t + n_shifts, 8)  # rows the kernel loads per step
    r_pad = (num_t_tiles - 1) * tile_t + span_rows

    # ---- center + reflect pad (torch.stft defaults), then zero-pad so the
    #      signal reshapes into exactly r_pad hop-sized rows. Valid frames
    #      never read the zero tail. ----
    y_padded = jnp.pad(y, ((0, 0), (pad, pad)), mode="reflect")
    total = r_pad * hop_length
    y_padded = jnp.pad(y_padded, ((0, 0), (0, total - y_padded.shape[1])))
    sig_rows = y_padded.reshape(B, r_pad, hop_length).astype(jnp.float32)

    kernel = functools.partial(_stft_frames_matmul_kernel,
                               tile_t=tile_t, span_rows=span_rows,
                               n_shifts=n_shifts)

    out = pl.pallas_call(
        kernel,
        out_shape=jax.ShapeDtypeStruct((B, T_pad, f_pad), jnp.float32),
        grid=(B, num_t_tiles),
        in_specs=[
            # whole per-batch signal; resident across the inner frame-tile axis
            pl.BlockSpec((None, r_pad, hop_length), lambda b, j: (b, 0, 0)),
            # window-folded DFT basis; resident across the whole grid
            pl.BlockSpec((n_fft, f_pad), lambda b, j: (0, 0)),
        ],
        out_specs=pl.BlockSpec((None, tile_t, f_pad), lambda b, j: (b, j, 0)),
        compiler_params=pltpu.CompilerParams(
            dimension_semantics=("parallel", "parallel")),
    )(sig_rows, basis)

    # [B, T_pad, F_pad] -> [B, F, T, 2]; slice+reshape+transpose fuse into a
    # single XLA copy.  (Consumers accepting [B, T, F, 2] could skip it.)
    spec = out[:, :T, :2 * f_bins].reshape(B, T, f_bins, 2)
    return jnp.transpose(spec, (0, 2, 1, 3))


def speech_mask_pallas(spectra_length, B, f_bins, T):
    """speech_mask[b, :, :spectra_length[b]] = 1 else 0 -> [B, F, T] f32."""
    t_lanes = _round_up(T, 128)
    mask_bt = pl.pallas_call(
        _speech_mask_kernel,
        out_shape=jax.ShapeDtypeStruct((B, t_lanes), jnp.float32),
    )(spectra_length.reshape(B, 1).astype(jnp.int32))
    # constant over F -> broadcast in the wrapper (kernel writes only [B, T]).
    return jnp.broadcast_to(mask_bt[:, None, :T], (B, f_bins, T))


class STFTFeaturePallas:
    """JAX/Pallas equivalent of STFTFeature (default-config forward)."""

    def __init__(self, n_fft=512, win_length=512, hop_length=128, window="hann"):
        self.win_length = win_length
        self.hop_length = hop_length
        self.n_fft = n_fft or 2 ** math.ceil(math.log2(win_length))
        assert self.n_fft == self.win_length, "win_length == n_fft assumed"
        assert self.n_fft % self.hop_length == 0, "hop must divide n_fft"

        # periodic windows (torch.hann_window / hamming_window defaults)
        nn = np.arange(self.win_length, dtype=np.float64)
        if window == "hann":
            w = 0.5 - 0.5 * np.cos(2.0 * np.pi * nn / self.win_length)
        elif window == "hamm":
            w = 0.54 - 0.46 * np.cos(2.0 * np.pi * nn / self.win_length)
        else:
            w = np.ones((self.win_length,), np.float64)
        self.window = jnp.asarray(w, jnp.float32)

        # Real-DFT basis, built once: X[k] = sum_n w[n] x[n] exp(-i 2pi k n / N).
        # Columns interleaved as [cos_0, -sin_0, cos_1, -sin_1, ...], window
        # folded in, zero-padded on the lane dim to a multiple of 128, bf16.
        self.f_bins = self.n_fft // 2 + 1
        self.f_pad = _round_up(2 * self.f_bins, 128)
        n = np.arange(self.n_fft, dtype=np.float64)[:, None]
        k = np.arange(self.f_bins, dtype=np.float64)[None, :]
        ang = 2.0 * np.pi * n * k / self.n_fft
        basis = np.zeros((self.n_fft, self.f_pad), dtype=np.float64)
        basis[:, 0:2 * self.f_bins:2] = np.cos(ang)
        basis[:, 1:2 * self.f_bins:2] = -np.sin(ang)
        basis *= w[:, None]                       # fold analysis window
        self.basis = jnp.asarray(basis, dtype=jnp.bfloat16)

    def _stft(self, y):
        return stft_pallas(y, n_fft=self.n_fft, hop_length=self.hop_length,
                           basis=self.basis, f_bins=self.f_bins)

    def forward(self, batch):
        perturbed = batch["perturbed"]                       # [B, t]
        perturbed_spec = self._stft(perturbed)               # [B, F, T, 2]
        batch["perturbed_spectra"] = perturbed_spec

        B, f_bins, T, _ = perturbed_spec.shape
        sample_length = batch["sample_length"]               # [B] int
        # int((L + win - win)/hop + 1) == L // hop + 1 for non-negative L
        # (assumes sample_length <= signal length, as in the torch module).
        spectra_length = (sample_length // self.hop_length + 1).astype(
            sample_length.dtype)
        batch["speech_mask"] = speech_mask_pallas(spectra_length, B, f_bins, T)
        batch["spectra_length"] = spectra_length

        if "clean" in batch:
            batch["clean_spectra"] = self._stft(batch["clean"])
        return batch


# ----------------------------------------------------------------------------
# Plain-JAX references for the self-check
# ----------------------------------------------------------------------------
def _frames_f32(y, n_fft, hop):
    B, t = y.shape
    pad = n_fft // 2
    yp = jnp.pad(y, ((0, 0), (pad, pad)), mode="reflect")
    T = 1 + t // hop
    idx = jnp.arange(T)[:, None] * hop + jnp.arange(n_fft)[None, :]
    return yp[:, idx]                                        # [B, T, n_fft]


def _reference_stft_f32(y, n_fft, hop, window):
    """Full f32 reference of the same math."""
    frames = _frames_f32(y, n_fft, hop) * window[None, None, :]
    B, T, _ = frames.shape
    n = np.arange(n_fft)[:, None]
    k = np.arange(n_fft // 2 + 1)[None, :]
    ang = 2.0 * np.pi * n * k / n_fft
    cr = jnp.asarray(np.cos(ang), jnp.float32)
    ci = jnp.asarray(-np.sin(ang), jnp.float32)
    real = jnp.einsum("btn,nf->btf", frames, cr)
    imag = jnp.einsum("btn,nf->btf", frames, ci)
    return jnp.transpose(jnp.stack([real, imag], -1), (0, 2, 1, 3))


def _reference_stft_bf16(y, n_fft, hop, basis_bf16, f_bins):
    """Reference using the same bf16 operands as the kernel (f32 accumulate)."""
    frames = _frames_f32(y, n_fft, hop).astype(jnp.bfloat16)
    B, T, _ = frames.shape
    out = jnp.einsum("btn,nf->btf", frames, basis_bf16,
                     preferred_element_type=jnp.float32)     # [B, T, F_pad]
    spec = out[..., :2 * f_bins].reshape(B, T, f_bins, 2)
    return jnp.transpose(spec, (0, 2, 1, 3))


# ----------------------------------------------------------------------------
# Demo / self-check
# ----------------------------------------------------------------------------
if __name__ == "__main__":
    key = jax.random.PRNGKey(0)
    k1, k2 = jax.random.split(key)

    B, t = 2, 1024
    n_fft = win_length = 256
    hop_length = 64

    perturbed = jax.random.normal(k1, (B, t), dtype=jnp.float32)
    clean = jax.random.normal(k2, (B, t), dtype=jnp.float32)
    sample_length = jnp.array([1024, 800], dtype=jnp.int32)

    batch = {"perturbed": perturbed, "clean": clean,
             "sample_length": sample_length}

    module = STFTFeaturePallas(n_fft=n_fft, win_length=win_length,
                               hop_length=hop_length, window="hann")
    out = module.forward(batch)
    jax.block_until_ready(out["perturbed_spectra"])
    jax.block_until_ready(out["clean_spectra"])
    jax.block_until_ready(out["speech_mask"])
    jax.block_until_ready(out["spectra_length"])

    F_bins = n_fft // 2 + 1
    T = 1 + t // hop_length
    assert out["perturbed_spectra"].shape == (B, F_bins, T, 2)
    assert out["clean_spectra"].shape == (B, F_bins, T, 2)

    # Tight check: kernel vs XLA using the SAME bf16 operands (kernel correctness).
    ref_q = _reference_stft_bf16(perturbed, n_fft, hop_length,
                                 module.basis, F_bins)
    assert jnp.allclose(out["perturbed_spectra"], ref_q, atol=1e-2, rtol=1e-3)

    # Loose check: vs full-f32 math; slack accounts for bf16 MXU-operand
    # quantization (flagged in the performance review).
    ref = _reference_stft_f32(perturbed, n_fft, hop_length, module.window)
    assert jnp.allclose(out["perturbed_spectra"], ref, atol=2e-1, rtol=2e-2)

    # Speech mask / spectra_length checks.
    assert out["speech_mask"].shape == (B, F_bins, T)
    # second sample: 800 // 64 + 1 = 13 frames masked on
    assert int(out["spectra_length"][1]) == 13
    assert float(out["speech_mask"][1, 0, :13].sum()) == 13.0
    assert float(out["speech_mask"][1, 0, 13:].sum()) == 0.0
    assert float(out["speech_mask"][0].sum()) == F_bins * T  # 1024//64+1 = 17 = T

    print("KERNEL_OK")
</pallas_src>

<mosaic_0001>
module attributes {stable_mosaic.version = 11 : i64} {
  func.func @_stft_frames_matmul_kernel(%arg0: i32, %arg1: i32, %arg2: memref<1x32x64xf32, #tpu.memory_space<vmem>>, %arg3: memref<256x384xbf16, #tpu.memory_space<vmem>>, %arg4: memref<1x24x384xf32, #tpu.memory_space<vmem>>) attributes {dimension_semantics = [#tpu.dimension_semantics<parallel>, #tpu.dimension_semantics<parallel>], iteration_bounds = array<i64: 2, 1>, scalar_prefetch = 0 : i64, scratch_operands = 0 : i64, tpu.core_type = #tpu.core_type<tc>, window_params = [{transform_indices = @transform_0, window_bounds = array<i64: 1, 32, 64>}, {pipeline_mode = #tpu.pipeline_mode<synchronous>, transform_indices = @transform_1, window_bounds = array<i64: 256, 384>}, {transform_indices = @transform_2, window_bounds = array<i64: 1, 24, 384>}]} {
    %c24_i32 = arith.constant 24 : i32
    %0 = arith.muli %arg1, %c24_i32 : i32
    %1 = tpu.assume_multiple %0, 8 : i32
    %c0 = arith.constant 0 : index
    %2 = arith.index_cast %1 : i32 to index
    %c0_0 = arith.constant 0 : index
    %3 = vector.load %arg2[%c0, %2, %c0_0] : memref<1x32x64xf32, #tpu.memory_space<vmem>>, vector<1x32x64xf32>
    %4 = vector.shape_cast %3 : vector<1x32x64xf32> to vector<32x64xf32>
    %5 = vector.extract_strided_slice %4 {offsets = [0, 0], sizes = [24, 64], strides = [1, 1]} : vector<32x64xf32> to vector<24x64xf32>
    %6 = vector.extract_strided_slice %4 {offsets = [1, 0], sizes = [24, 64], strides = [1, 1]} : vector<32x64xf32> to vector<24x64xf32>
    %7 = vector.extract_strided_slice %4 {offsets = [2, 0], sizes = [24, 64], strides = [1, 1]} : vector<32x64xf32> to vector<24x64xf32>
    %8 = vector.extract_strided_slice %4 {offsets = [3, 0], sizes = [24, 64], strides = [1, 1]} : vector<32x64xf32> to vector<24x64xf32>
    %9 = tpu.concatenate %5, %6, %7, %8 in 1 : vector<24x64xf32>, vector<24x64xf32>, vector<24x64xf32>, vector<24x64xf32> -> vector<24x256xf32>
    %10 = arith.truncf %9 : vector<24x256xf32> to vector<24x256xbf16>
    %c0_1 = arith.constant 0 : index
    %c0_2 = arith.constant 0 : index
    %11 = vector.load %arg3[%c0_1, %c0_2] : memref<256x384xbf16, #tpu.memory_space<vmem>>, vector<256x384xbf16>
    %cst = arith.constant dense<0.000000e+00> : vector<24x384xf32>
    %12 = tpu.matmul %10, %11, %cst {dimension_numbers = #tpu.dot_dimension_numbers<[1], [0], [0], [1], [0, 0, 1, 1], [], []>} : vector<24x256xbf16>, vector<256x384xbf16>, vector<24x384xf32> -> vector<24x384xf32>
    %c0_3 = arith.constant 0 : index
    %c0_4 = arith.constant 0 : index
    %c0_5 = arith.constant 0 : index
    %13 = vector.load %arg4[%c0_3, %c0_4, %c0_5] : memref<1x24x384xf32, #tpu.memory_space<vmem>>, vector<1x24x384xf32>
    %14 = vector.shape_cast %13 : vector<1x24x384xf32> to vector<24x384xf32>
    %15 = vector.shape_cast %12 : vector<24x384xf32> to vector<1x24x384xf32>
    tpu.vector_store %arg4[%c0_3, %c0_4, %c0_5], %15 {strides = array<i32>} : memref<1x24x384xf32, #tpu.memory_space<vmem>>, vector<1x24x384xf32>,
    return
  }
  func.func @transform_0(%arg0: i32, %arg1: i32) -> (i32, i32, i32) {
    %c0_i32 = arith.constant 0 : i32
    %c0_i32_0 = arith.constant 0 : i32
    %c0_i32_1 = arith.constant 0 : i32
    return %arg0, %c0_i32, %c0_i32_0 : i32, i32, i32
  }
  func.func @transform_1(%arg0: i32, %arg1: i32) -> (i32, i32) {
    %c0_i32 = arith.constant 0 : i32
    %c0_i32_0 = arith.constant 0 : i32
    %c0_i32_1 = arith.constant 0 : i32
    return %c0_i32, %c0_i32_0 : i32, i32
  }
  func.func @transform_2(%arg0: i32, %arg1: i32) -> (i32, i32, i32) {
    %c0_i32 = arith.constant 0 : i32
    %c0_i32_0 = arith.constant 0 : i32
    return %arg0, %arg1, %c0_i32 : i32, i32, i32
  }
}

</mosaic_0001>

<bundles_post_ra>
// kernel: tpu_custom_call.1
= control target key start
LH: loop header
LB: loop body
LE: loop exit
PB: predicated region body
PF: predicated region fallthrough
CT: control target
= control target key end

     0   :  { %7 = vsyncpa [#allocation3], 0  ;;  %s1478_s0 = inlined_call_operand.hbm [shape: f32[2,32,64], index: 0, kind: input, shape index: {}]   ;;  %s1479_s1 = inlined_call_operand.hbm [shape: bf16[256,384], index: 1, kind: input, shape index: {}]   ;;  %s1480_s2 = inlined_call_operand.hbm [shape: f32[2,24,384], index: 2, kind: output, shape index: {}]  }
   0x1   :  { %9 = vsyncpa [#allocation3 + $0x1], 0 }
   0x2   :  { %10 = vsyncpa [#allocation6], 0 }
   0x3   :  { %11 = vsyncpa [#allocation4], 0 }
   0x4   :  { %13 = vsyncpa [#allocation4 + $0x1], 0  ;;  %s1223_s9 = smov 0   ;;  %s1225_s10 = smov 0  }
   0x5   :  { %s1227_s11 = smov 0   ;;  %s1229_s12 = smov 0  }
   0x6   :  { %s1231_s13 = smov 0   ;;  %s1233_s14 = smov 0  }
   0x7 LB: > { %s800_s15 = sadd.s32 4294967295, %s1196_s14   ;;  %s801_s16 = sadd.s32 4294967294, %s1196_s14   ;;  %s1196_s14 = sphi %s1233_s14, %s19_s14   ;;  %s1192_s13 = sphi %s1231_s13, %s1504_s13   ;;  %s1188_s12 = sphi %s1229_s12, %s1503_s12   ;;  %s1184_s11 = sphi %s1227_s11, %s1502_s11   ;;  %s1180_s10 = sphi %s1225_s10, %s1501_s10   ;;  %s1176_s9 = sphi %s1223_s9, %s1500_s9  }
   0x8   : > { %p51_p0 = scmp.ne.s32.totalorder %s1180_s10, %s1176_s9  ;;  %p1257_p1 = scmp.eq.s32.totalorder %s800_s15, 0 }
   0x9   : > { %p1261_p2 = scmp.eq.s32.totalorder %s800_s15, 1  ;;  %p104_p3 = scmp.eq.s32.totalorder %s801_s16, 1 }
   0xa   : > { %s1485_s17 = scalar_select %p1257_p1, 1, 0 }
   0xb   : > { %s1486_s18 = scalar_select %p1261_p2, 1, 0 }
   0xc   : > { %p1267_p4 = por %p1257_p1, %p51_p0  ;;  %p802_p5 = scmp.ge.s32.totalorder %s1196_s14, 1 }
   0xd   : > { %p1272_p6 = por %p104_p3, %p51_p0  ;;  %p111_p7 = scmp.lt.s32.totalorder %s1196_s14, 3 }
   0xe   : > { %s1487_s19 = scalar_select %p1267_p4, 1, 0 }
   0xf   : > { %s1488_s20 = scalar_select %p1272_p6, 1, 0 }
  0x10   : > { %p1277_p8 = pnand %p802_p5, %p111_p7  ;;  %s1198_s22 = smov [#allocation5]  }
  0x11   : > { %s123_s23 = sshll.u32 %s1198_s22, 4  ;;  %s31_s25 = sadd.s32 1, %s1192_s13  ;;  %s124_s23 = int_to_ptr.vmem [resolvable:$true] %s123_s23 }
  0x12   : > { %s1489_s21 = scalar_select %p1277_p8, 1, 0 }
  0x13   : > { %p901_p9 = pneg %p1277_p8  ;;  %s1052_s28 = scalar_lea.hbm %s1479_s1, 6144 }
  0x14   : > { %p1053_p12 = scmp.ne.s32.totalorder %s1479_s1, %s1052_s28  ;;  %p1059_p5 = scmp.lt.u32.totalorder %s1052_s28, %s1479_s1 }
  0x15   : > { %p1286_p11 = pnand %p901_p9, %p1257_p1 }
  0x17   : > { %p1054_p13 = pneg %p1286_p11 }
  0x19   : > { %p1055_p0 = pnand %p1054_p13, %p1053_p12 }
  0x1b   : > { %p1056_p3 = pneg %p1055_p0 }
  0x1d   : > { %p1061_p7 = pnand %p1059_p5, %p1056_p3 }
  0x1f   : > { %1064 = shalt.err (!%p1061_p7)
}
  0x20   : > { %s1065_s5 = scalar_lea.vmem %s124_s23, 6144  ;;  %p1073_p1 = scmp.lt.s32.totalorder %s124_s23, %s124_s23 }
  0x21   : > { %p1066_p9 = scmp.ne.s32.totalorder %s124_s23, %s1065_s5  ;;  %p1074_p4 = scmp.lt.s32.totalorder %s1065_s5, %s1065_s5 }
  0x23   : > { %p1068_p10 = pnand %p1066_p9, %p1054_p13  ;;  %p1075_p8 = por %p1074_p4, %p1073_p1 }
  0x25   : > { %p1069_p6 = pneg %p1068_p10 }
  0x27   : > { %p1076_p2 = pnand %p1075_p8, %p1069_p6 }
  0x29   : > { %1079 = shalt.err (!%p1076_p2)
}
  0x2a   : > { %s1199_s6 = smov 192   ;;  %s1200_s7 = smov 12  }
  0x2b   : > { %904 = dma.hbm_to_vmem [thread:$0]  (!%p1286_p11), %s1479_s1, 6144, %s124_s23, [#allocation6], %s1199_s6, %s1199_s6, %s1200_s7  }
  0x2c   : > { %p33_p1 = scmp.ge.s32.totalorder %s31_s25, 2  ;;  %s38_s16 = sadd.s32 1, %s1184_s11 }
  0x2d   : > { %p45_p2 = scmp.ne.s32.totalorder %s1184_s11, %s1180_s10  ;;  %p46_p4 = scmp.eq.s32.totalorder %s1196_s14, 0 }
  0x2e   : > { %s1506_s25 = smov (%p33_p1, %s31_s25), 0  ;;  %p1492_p8 = scmp.ne.s32.totalorder %s1486_s18, 0 }
  0x2f   : > { %p1313_p6 = por %p46_p4, %p45_p2  ;;  %s35_s24 = ssub.s32 %s1192_s13, %s1506_s25 }
  0x30   : > { %p1319_p10 = por %p1492_p8, %p45_p2  ;;  %p914_p12 = scmp.lt.s32.totalorder %s1196_s14, 2 }
  0x31   : > { %p36_p11 = scmp.eq.s32.totalorder %s35_s24, 0  ;;  %s137_s23 = sand.u32 1, %s1184_s11  }
  0x32   : > { %s805_s27 = sshll.u32 %s137_s23, 5  ;;  %s862_s29 = sshll.u32 %s1192_s13, 9 }
  0x33   : > { %s1328_s28 = scalar_select %p36_p11, %s1184_s11, %s38_s16  }
  0x34   : > { %s1334_s4 = scalar_lea.hbm %s1478_s0, %s862_s29  ;;  %s141_s18 = scalar_lea.vmem [#allocation2], %s805_s27 }
  0x35   : > { %s148_s5 = sshll.u32 %s141_s18, 4  ;;  %p1340_p13 = pnand %p914_p12, %p1313_p6  ;;  %s1336_s5 = int_to_ptr.vmem [resolvable:$true] %s148_s5 }
  0x36   : > { %s1344_s7 = scalar_lea.sflag [#allocation3], %s137_s23  ;;  %s1080_s8 = scalar_lea.hbm %s1334_s4, 512 }
  0x37   : > { %p1081_p0 = scmp.ne.s32.totalorder %s1334_s4, %s1080_s8  ;;  %p1082_p3 = pneg %p1340_p13 }
  0x38   : > { %s1085_s22 = scalar_lea.hbm %s1478_s0, 1024  ;;  %p1086_p9 = scmp.lt.u32.totalorder %s1334_s4, %s1478_s0 }
  0x39   : > { %p1083_p5 = pnand %p1082_p3, %p1081_p0  ;;  %p1087_p1 = scmp.lt.u32.totalorder %s1085_s22, %s1080_s8 }
  0x3a   : > { %p1089_p4 = scmp.lt.u32.totalorder %s1080_s8, %s1334_s4 }
  0x3b   : > { %p1084_p7 = pneg %p1083_p5  ;;  %p1088_p2 = por %p1087_p1, %p1086_p9 }
  0x3d   : > { %p1090_p6 = por %p1089_p4, %p1088_p2 }
  0x3f   : > { %p1091_p8 = pnand %p1090_p6, %p1084_p7 }
  0x41   : > { %1094 = shalt.err (!%p1091_p8)
}
  0x42   : > { %s1095_s23 = scalar_lea.vmem %s1336_s5, 512  ;;  %s1201_s29 = smov [#allocation2]  }
  0x43   : > { %p1096_p12 = scmp.ne.s32.totalorder %s1336_s5, %s1095_s23  ;;  %s1100_s30 = sshll.u32 %s1201_s29, 4  ;;  %s1101_s30 = int_to_ptr.vmem [resolvable:$false] %s1100_s30 }
  0x44   : > { %s1102_s3 = scalar_lea.vmem %s1101_s30, 1024  ;;  %p1103_p5 = scmp.lt.s32.totalorder %s1336_s5, %s1101_s30 }
  0x45   : > { %p1098_p11 = pnand %p1096_p12, %p1082_p3  ;;  %p1104_p9 = scmp.lt.s32.totalorder %s1102_s3, %s1095_s23 }
  0x47   : > { %p1099_p0 = pneg %p1098_p11  ;;  %p1105_p1 = por %p1104_p9, %p1103_p5 }
  0x49   : > { %p1106_p2 = pnand %p1105_p1, %p1099_p0 }
  0x4b   : > { %1109 = shalt.err (!%p1106_p2)
}
  0x4c   : > { %s1202_s18 = smov 128   ;;  %s1203_s8 = smov 8  }
  0x4d   : > { %908 = dma.hbm_to_vmem [thread:$0]  (!%p1340_p13), %s1334_s4, 512, %s1336_s5, %s1344_s7, %s1202_s18, %s1202_s18, %s1203_s8  }
  0x4e   : > { %p1495_p3 = scmp.ne.s32.totalorder %s1489_s21, 0 }
  0x4f   : > { %s1375_s15 = sand.u32 (!%p1495_p3), 1, %s1180_s10   ;;  %p1496_p7 = scmp.ne.s32.totalorder (!%p1495_p3), %s1487_s19, 0 }
  0x50   : > { %160 = sbr.rel (%p1495_p3) target bundleno = 460 (0x1cc), region = 28  ;;  %s809_s16 = sshll.u32 (!%p1495_p3), %s1375_s15, 5 }
  0x51   : > { %s163_s22 = scalar_lea.sflag (!%p1495_p3), [#allocation3], %s1375_s15  ;;  %s166_s24 = scalar_lea.vmem (!%p1495_p3), [#allocation2], %s809_s16 }
  0x57   : > { %1163 = dma.done.wait (%p1496_p7), %s163_s22, 512  }
  0x58   : > { %1165 = vsyncadd (%p1496_p7), %s163_s22, 4294966784  ;;  %p1497_p4 = scmp.ne.s32.totalorder %s1485_s17, 0 }
  0x5a   : > { %1167 = dma.done.wait (%p1497_p4), [#allocation6], 6144  }
  0x5b   : > { %1169 = vsyncadd (%p1497_p4), [#allocation6], 4294961152  ;;  %v1387_v0 = vld [vmem:[%s166_s24] sm:$0xff]  ;;  %v1389_v1 = vld [vmem:[%s166_s24 + $0x8] sm:$0xff]  ;;  %vm231_vm0 = vcmask 1044480   ;;  %vm203_vm1 = vcmask 1046528  }
  0x5c   : > { %v1391_v2 = vld [vmem:[%s166_s24 + $0x10] sm:$0xff]  ;;  %v232_v3 = vrot.slane %v1387_v0, 3  ;;  %v233_v4 = vrot.slane %v1389_v1, 3  ;;  %v204_v6 = vrot.slane %v1387_v0, 1  ;;  %v1397_v7 = vld [vmem:[%s166_s24 + $0x18] sm:$0xff]  ;;  %v205_v8 = vrot.slane %v1389_v1, 1 }
  0x5d   : > { %v235_v5 = vrot.slane %v1391_v2, 3  ;;  %v207_v9 = vrot.slane %v1391_v2, 1  ;;  %v209_v10 = vrot.slane %v1397_v7, 1  ;;  %v237_v11 = vrot.slane %v1397_v7, 3  ;;  %v988_v14 = vld [vmem:[#allocation5 + $0x4] ss:$12 sps:$4 sm:$0xff]  }
  0x5e   : > { %v234_v12 = vsel %vm231_vm0, %v232_v3, %v233_v4  ;;  %v990_v15 = vld [vmem:[#allocation5] ss:$12 sps:$4 sm:$0xff]   ;;  %v206_v17 = vsel %vm203_vm1, %v204_v6, %v205_v8  ;;  %v991_v20 = vld [vmem:[#allocation5 + $0x1c] ss:$12 sps:$4 sm:$0xff]   ;;  %579 = vmatprep.subr.bf16.mxu0 %v988_v14  ;;  %s1204_s17 = smov 64   ;;  %vm220_vm2 = vcmask 1045504  }
  0x5f   : > { %v236_v13 = vsel %vm231_vm0, %v233_v4, %v235_v5  ;;  %v208_v18 = vsel %vm203_vm1, %v205_v8, %v207_v9  ;;  %v210_v19 = vsel %vm203_vm1, %v207_v9, %v209_v10  ;;  %v238_v21 = vsel %vm231_vm0, %v235_v5, %v237_v11  ;;  %580 = vmatpush1.bf16.msra.mxu0 %v990_v15  ;;  %v993_v24 = vld [vmem:[#allocation5 + $0x18] ss:$12 sps:$4 sm:$0xff]   ;;  %v994_v25 = vld [vmem:[#allocation5 + $0x34] ss:$12 sps:$4 sm:$0xff]   ;;  %v996_v26 = vld [vmem:[#allocation5 + $0x30] ss:$12 sps:$4 sm:$0xff]  }
  0x60   : > { %v973_v16 = vpack.i.bf16 %v236_v13, %v234_v12  ;;  %v978_v22 = vpack.i.bf16 %v208_v18, %v206_v17  ;;  %v983_v23 = vpack.i.bf16 %v210_v19, %v238_v21  ;;  %581 = vmatprep.subr.bf16.mxu0 %v991_v20  ;;  %v997_v27 = vld [vmem:[#allocation5 + $0x4c] ss:$12 sps:$4 sm:$0xff]   ;;  %v999_v28 = vld [vmem:[#allocation5 + $0x48] ss:$12 sps:$4 sm:$0xff]   ;;  %v1000_v29 = vld [vmem:[#allocation5 + $0x64] ss:$12 sps:$4 sm:$0xff]  }
  0x61   : > { %v1014_v30 = vld [vmem:[#allocation5 + $0xc8] ss:$12 sps:$4 sm:$0xff]   ;;  %v1002_v32 = vld [vmem:[#allocation5 + $0x60] ss:$12 sps:$4 sm:$0xff]   ;;  %v1005_v36 = vld [vmem:[#allocation5 + $0x78] ss:$12 sps:$4 sm:$0xff]  }
  0x62   : > { %974 = vrot.lane.b32.xlu0 %v973_v16, %s1204_s17  ;;  %984 = vrot.lane.b32.xlu1 %v983_v23, %s1204_s17  ;;  %v1016_v31 = vld [vmem:[#allocation5 + $0x8] ss:$12 sps:$4 sm:$0xff]   ;;  %v1019_v33 = vld [vmem:[#allocation5 + $0xe0] ss:$12 sps:$4 sm:$0xff]   ;;  %v1024_v37 = vld [vmem:[#allocation5 + $0xf8] ss:$12 sps:$4 sm:$0xff]  }
  0x63   : > { %582 = vmatpush1.bf16.msra.mxu0 %v993_v24  ;;  %863 = vmatprep.subr.bf16.mxu1 %v1014_v30  ;;  %v1003_v34 = vld [vmem:[#allocation5 + $0x7c] ss:$12 sps:$4 sm:$0xff]   ;;  %v1021_v35 = vld [vmem:[#allocation5 + $0x20] ss:$12 sps:$4 sm:$0xff]   ;;  %v1026_v38 = vld [vmem:[#allocation5 + $0x38] ss:$12 sps:$4 sm:$0xff]  }
  0x64   : > { %583 = vmatprep.subr.bf16.mxu0 %v994_v25  ;;  %864 = vmatpush3.bf16.msra.mxu1 %v1016_v31  ;;  %v1006_v39 = vld [vmem:[#allocation5 + $0x94] ss:$12 sps:$4 sm:$0xff]   ;;  %v1008_v40 = vld [vmem:[#allocation5 + $0x90] ss:$12 sps:$4 sm:$0xff]   ;;  %v1009_v43 = vld [vmem:[#allocation5 + $0xac] ss:$12 sps:$4 sm:$0xff]  }
  0x65   : > { %865 = vmatprep.subr.bf16.mxu1 %v1019_v33  ;;  %v1029_v41 = vld [vmem:[#allocation5 + $0x110] ss:$12 sps:$4 sm:$0xff]   ;;  %v1034_v44 = vld [vmem:[#allocation5 + $0x128] ss:$12 sps:$4 sm:$0xff]   ;;  %v1039_v48 = vld [vmem:[#allocation5 + $0x140] ss:$12 sps:$4 sm:$0xff]  }
  0x66   : > { %979 = vrot.lane.b32.xlu0 %v978_v22, %s1204_s17  ;;  %v1031_v42 = vld [vmem:[#allocation5 + $0x50] ss:$12 sps:$4 sm:$0xff]   ;;  %v1036_v45 = vld [vmem:[#allocation5 + $0x68] ss:$12 sps:$4 sm:$0xff]   ;;  %v1041_v49 = vld [vmem:[#allocation5 + $0x80] ss:$12 sps:$4 sm:$0xff]  }
  0x67   : > { %584 = vmatpush1.bf16.msra.mxu0 %v996_v26  ;;  %v1011_v46 = vld [vmem:[#allocation5 + $0xa8] ss:$12 sps:$4 sm:$0xff]   ;;  %v1012_v47 = vld [vmem:[#allocation5 + $0xc4] ss:$12 sps:$4 sm:$0xff]   ;;  %v1015_v50 = vld [vmem:[#allocation5 + $0xc0] ss:$12 sps:$4 sm:$0xff]  }
  0x68   : > { %585 = vmatprep.subr.bf16.mxu0 %v997_v27  ;;  %866 = vmatpush3.bf16.msra.mxu1 %v1021_v35  ;;  %v1044_v51 = vld [vmem:[#allocation5 + $0x158] ss:$12 sps:$4 sm:$0xff]   ;;  %v1017_v52 = vld [vmem:[#allocation5 + $0xdc] ss:$12 sps:$4 sm:$0xff]   ;;  %v1022_v56 = vld [vmem:[#allocation5 + $0xf4] ss:$12 sps:$4 sm:$0xff]  }
  0x69   : > { %867 = vmatprep.subr.bf16.mxu1 %v1024_v37  ;;  %v1020_v53 = vld [vmem:[#allocation5 + $0xd8] ss:$12 sps:$4 sm:$0xff]   ;;  %v1049_v55 = vld [vmem:[#allocation5 + $0x170] ss:$12 sps:$4 sm:$0xff]   ;;  %v1030_v60 = vld [vmem:[#allocation5 + $0x108] ss:$12 sps:$4 sm:$0xff]  }
  0x6a   : > { %v1046_v54 = vld [vmem:[#allocation5 + $0x98] ss:$12 sps:$4 sm:$0xff]   ;;  %v1051_v57 = vld [vmem:[#allocation5 + $0xb0] ss:$12 sps:$4 sm:$0xff]   ;;  %v1035_v62 = vld [vmem:[#allocation5 + $0x120] ss:$12 sps:$4 sm:$0xff]  }
  0x6b   : > { %586 = vmatpush1.bf16.msra.mxu0 %v999_v28  ;;  %v1025_v58 = vld [vmem:[#allocation5 + $0xf0] ss:$12 sps:$4 sm:$0xff]   ;;  %v1027_v59 = vld [vmem:[#allocation5 + $0x10c] ss:$12 sps:$4 sm:$0xff]   ;;  %v1042_v4 = vld [vmem:[#allocation5 + $0x154] ss:$12 sps:$4 sm:$0xff]  }
  0x6c   : > { %587 = vmatprep.subr.bf16.mxu0 %v1000_v29  ;;  %868 = vmatpush3.bf16.msra.mxu1 %v1026_v38  ;;  %v1032_v61 = vld [vmem:[#allocation5 + $0x124] ss:$12 sps:$4 sm:$0xff]   ;;  %v1037_v63 = vld [vmem:[#allocation5 + $0x13c] ss:$12 sps:$4 sm:$0xff]   ;;  %v1047_v6 = vld [vmem:[#allocation5 + $0x16c] ss:$12 sps:$4 sm:$0xff]  }
  0x6d   : > { %869 = vmatprep.subr.bf16.mxu1 %v1029_v41  ;;  %v1040_v3 = vld [vmem:[#allocation5 + $0x138] ss:$12 sps:$4 sm:$0xff]   ;;  %v1045_v5 = vld [vmem:[#allocation5 + $0x150] ss:$12 sps:$4 sm:$0xff]   ;;  %v1050_v8 = vld [vmem:[#allocation5 + $0x168] ss:$12 sps:$4 sm:$0xff]  }
  0x6e   : > { %v221_v9 = vrot.slane %v1387_v0, 2  ;;  %v222_v10 = vrot.slane %v1389_v1, 2  ;;  %v224_v11 = vrot.slane %v1391_v2, 2  ;;  %v226_v12 = vrot.slane %v1397_v7, 2  ;;  %s891_s19 = smul.u32 72, %s1375_s15  ;;  %s1205_s29 = smov [#allocation7]  }
  0x6f   : > { %588 = vmatpush1.bf16.msra.mxu0 %v1002_v32  ;;  %vm248_vm3 = vcmask 523264   ;;  %s892_s5 = smul.u32 1152, %s1188_s12  ;;  %s688_s12 = scalar_lea.sflag [#allocation4], %s1375_s15 }
  0x70   : > { %589 = vmatprep.subr.bf16.mxu0 %v1003_v34  ;;  %870 = vmatpush3.bf16.msra.mxu1 %v1031_v42  ;;  %v223_v14 = vsel %vm220_vm2, %v221_v9, %v222_v10  ;;  %v225_v15 = vsel %vm220_vm2, %v222_v10, %v224_v11  ;;  %v227_v19 = vsel %vm220_vm2, %v224_v11, %v226_v12  ;;  %s190_s21 = scalar_lea.vmem [#allocation7], %s891_s19  ;;  %s1114_s30 = sshll.u32 %s1205_s29, 4  ;;  %s1115_s30 = int_to_ptr.vmem [resolvable:$false] %s1114_s30 }
  0x71   : > { %871 = vmatprep.subr.bf16.mxu1 %v1034_v44  ;;  %s704_s4 = sshll.u32 %s190_s21, 4  ;;  %s1429_s27 = scalar_lea.hbm %s1480_s2, %s892_s5  ;;  %s1424_s4 = int_to_ptr.vmem [resolvable:$true] %s704_s4 }
  0x72   : > { %s1110_s23 = scalar_lea.vmem %s1424_s4, 1152  ;;  %s1116_s3 = scalar_lea.vmem %s1115_s30, 2304 }
  0x73   : > { %590 = vmatpush1.bf16.msra.mxu0 %v1005_v36  ;;  %p1111_p13 = scmp.ne.s32.totalorder %s1424_s4, %s1110_s23  ;;  %p1117_p12 = scmp.lt.s32.totalorder %s1424_s4, %s1115_s30 }
  0x74   : > { %591 = vmatprep.subr.bf16.mxu0 %v1006_v39  ;;  %872 = vmatpush3.bf16.msra.mxu1 %v1036_v45  ;;  %p1118_p11 = scmp.lt.s32.totalorder %s1116_s3, %s1110_s23 }
  0x75   : > { %873 = vmatprep.subr.bf16.mxu1 %v1039_v48  ;;  %p1112_p6 = pnand %p1111_p13, %p1319_p10 }
  0x76   : > { %p1119_p0 = por %p1118_p11, %p1117_p12 }
  0x77   : > { %592 = vmatpush1.bf16.msra.mxu0 %v1008_v40  ;;  %p1113_p8 = pneg %p1112_p6 }
  0x78   : > { %593 = vmatprep.subr.bf16.mxu0 %v1009_v43  ;;  %874 = vmatpush3.bf16.msra.mxu1 %v1041_v49 }
  0x79   : > { %875 = vmatprep.subr.bf16.mxu1 %v1044_v51  ;;  %p1120_p5 = pnand %p1119_p0, %p1113_p8 }
  0x7b   : > { %594 = vmatpush1.bf16.msra.mxu0 %v1011_v46 }
  0x7c   : > { %595 = vmatprep.subr.bf16.mxu0 %v1012_v47  ;;  %876 = vmatpush3.bf16.msra.mxu1 %v1046_v54 }
  0x7d   : > { %877 = vmatprep.subr.bf16.mxu1 %v1049_v55 }
  0x7f   : > { %596 = vmatpush1.bf16.msra.mxu0 %v1015_v50 }
  0x80   : > { %597 = vmatprep.subr.bf16.mxu0 %v1017_v52  ;;  %878 = vmatpush3.bf16.msra.mxu1 %v1051_v57 }
  0x83   : > { %598 = vmatpush1.bf16.msra.mxu0 %v1020_v53 }
  0x84   : > { %599 = vmatprep.subr.bf16.mxu0 %v1022_v56 }
  0x87   : > { %600 = vmatpush1.bf16.msra.mxu0 %v1025_v58 }
  0x88   : > { %601 = vmatprep.subr.bf16.mxu0 %v1027_v59 }
  0x8b   : > { %602 = vmatpush1.bf16.msra.mxu0 %v1030_v60 }
  0x8c   : > { %603 = vmatprep.subr.bf16.mxu0 %v1032_v61 }
  0x8f   : > { %604 = vmatpush1.bf16.msra.mxu0 %v1035_v62 }
  0x90   : > { %605 = vmatprep.subr.bf16.mxu0 %v1037_v63 }
  0x93   : > { %606 = vmatpush1.bf16.msra.mxu0 %v1040_v3 }
  0x94   : > { %607 = vmatprep.subr.bf16.mxu0 %v1042_v4 }
  0x97   : > { %608 = vmatpush1.bf16.msra.mxu0 %v1045_v5 }
  0x98   : > { %609 = vmatprep.subr.bf16.mxu0 %v1047_v6 }
  0x9b   : > { %610 = vmatpush1.bf16.msra.mxu0 %v1050_v8 }
  0xd4   : > { %v975_v13 = vpop.permute.xlu0 %974  ;;  %v985_v18 = vpop.permute.xlu1 %984 }
  0xd5   : > { %v977_v16 = vunpack.i.h.bf16 %v975_v13  ;;  %v976_v17 = vunpack.i.l.bf16 %v975_v13  ;;  %v986_v22 = vunpack.i.l.bf16 %v985_v18  ;;  %v987_v29 = vunpack.i.h.bf16 %v985_v18 }
  0xd7   : > { %v252_v20 = vsel %vm248_vm3, %v223_v14, %v976_v17  ;;  %v253_v21 = vsel %vm248_vm3, %v225_v15, %v977_v16  ;;  %v254_v27 = vsel %vm248_vm3, %v227_v19, %v986_v22  ;;  %v251_v32 = vsel %vm248_vm3, %v1391_v2, %v987_v29 }
  0xd8   : > { %v980_v23 = vpop.permute.xlu0 %979  ;;  %v256_v24 = vpack.c.bf16 %v253_v21, %v252_v20  ;;  %v258_v30 = vpack.c.bf16 %v254_v27, %v254_v27  ;;  %v257_v33 = vpack.c.bf16 %v251_v32, %v251_v32 }
  0xd9   : > { %v982_v25 = vunpack.i.h.bf16 %v980_v23  ;;  %v981_v26 = vunpack.i.l.bf16 %v980_v23 }
  0xda   : > { %611 = vmatprep.mubr.bf16.mxu0 %v256_v24  ;;  %662 = vmatprep.mubr.bf16.mxu1 %v256_v24 }
  0xdb   : > { %v249_v7 = vsel %vm248_vm3, %v1387_v0, %v981_v26  ;;  %v250_v28 = vsel %vm248_vm3, %v1389_v1, %v982_v25 }
  0xdc   : > { %v255_v31 = vpack.c.bf16 %v250_v28, %v249_v7 }
  0xde   : > { %612 = vmatmul.mubr.bf16.vlgmr.msra.gmra.mrb[0].mxu0 %v255_v31  ;;  %663 = vmatmul.mubr.bf16.vlgmr.msra.gmra.mrb[0].mxu1 %v255_v31 }
  0xdf   : > { %621 = vmatprep.mubr.bf16.mxu0 %v258_v30  ;;  %670 = vmatprep.mubr.bf16.mxu1 %v258_v30 }
  0xe6   : > { %622 = vmatmul.mubr.bf16.gmra.mrb[4].mxu0 %v257_v33  ;;  %671 = vmatmul.mubr.bf16.gmra.mrb[4].mxu1 %v257_v33 }
 0x1b1   : > { %v613_v34 = vpop.f32.mrb[0].mxu0  ;;  %v879_v35 = vpop.f32.mrb[0].mxu1 }
 0x1b2   : > { %678 = vst [vmem:[%s190_s21] sm:$0xff] %v613_v34  ;;  %v615_v0 = vpop.f32.mrb[1].mxu0  ;;  %v880_v1 = vpop.f32.mrb[1].mxu1 }
 0x1b3   : > { %679 = vst [vmem:[%s190_s21 + $0x8] sm:$0xff] %v615_v0  ;;  %v881_v36 = vadd.f32 %v880_v1, %v879_v35  ;;  %v617_v37 = vpop.f32.mrb[2].mxu0  ;;  %v882_v38 = vpop.f32.mrb[2].mxu1 }
 0x1b4   : > { %681 = vst [vmem:[%s190_s21 + $0x18] sm:$0xff] %v617_v37  ;;  %v619_v39 = vpop.f32.mrb[3].mxu0  ;;  %v883_v40 = vpop.f32.mrb[3].mxu1 }
 0x1b5   : > { %680 = vst [vmem:[%s190_s21 + $0x10] sm:$0xff] %v881_v36  ;;  %682 = vst [vmem:[%s190_s21 + $0x20] sm:$0xff] %v619_v39  ;;  %v884_v2 = vadd.f32 %v883_v40, %v882_v38 }
 0x1b7   : > { %683 = vst [vmem:[%s190_s21 + $0x28] sm:$0xff] %v884_v2 }
 0x1b9   : > { %v623_v41 = vpop.f32.mrb[4].mxu0  ;;  %v885_v42 = vpop.f32.mrb[4].mxu1 }
 0x1ba   : > { %684 = vst [vmem:[%s190_s21 + $0x30] sm:$0xff] %v623_v41  ;;  %v625_v43 = vpop.f32.mrb[5].mxu0  ;;  %v886_v44 = vpop.f32.mrb[5].mxu1 }
 0x1bb   : > { %685 = vst [vmem:[%s190_s21 + $0x38] sm:$0xff] %v625_v43  ;;  %v887_v45 = vadd.f32 %v886_v44, %v885_v42  ;;  %v627_v46 = vpop.f32.mrb[6].mxu0  ;;  %v888_v47 = vpop.f32.mrb[6].mxu1 }
 0x1bc   : > { %v628_v48 = vpop.f32.mrb[7].mxu0  ;;  %v889_v49 = vpop.f32.mrb[7].mxu1 }
 0x1bd   : > { %686 = vst [vmem:[%s190_s21 + $0x40] sm:$0xff] %v887_v45 }
 0x1be   : > { %1123 = shalt.err (!%p1120_p5)
}
 0x1bf   : > { %s1124_s18 = scalar_lea.hbm %s1429_s27, 1152  ;;  %s1128_s22 = scalar_lea.hbm %s1480_s2, 2304 }
 0x1c0   : > { %p1125_p9 = scmp.ne.s32.totalorder %s1429_s27, %s1124_s18  ;;  %p1129_p3 = scmp.lt.u32.totalorder %s1429_s27, %s1480_s2 }
 0x1c1   : > { %p1130_p7 = scmp.lt.u32.totalorder %s1128_s22, %s1124_s18  ;;  %p1132_p13 = scmp.lt.u32.totalorder %s1124_s18, %s1429_s27 }
 0x1c2   : > { %p1126_p1 = pnand %p1125_p9, %p1319_p10 }
 0x1c3   : > { %p1131_p4 = por %p1130_p7, %p1129_p3 }
 0x1c4   : > { %p1127_p2 = pneg %p1126_p1 }
 0x1c5   : > { %p1133_p6 = por %p1132_p13, %p1131_p4 }
 0x1c7   : > { %p1134_p8 = pnand %p1133_p6, %p1127_p2 }
 0x1c9   : > { %1137 = shalt.err (!%p1134_p8)
}
 0x1ca   : > { %s1206_s19 = smov 384   ;;  %s1207_s21 = smov 24  }
 0x1cb   : > { %899 = dma.vmem_to_hbm [thread:$0]  (%p1319_p10), %s1424_s4, 1152, %s1429_s27, %s688_s12, %s1206_s19, %s1206_s19, %s1207_s21  }
 0x1cc PF: > { %s719_s5 = sand.u32 1, %s1176_s9   ;;  %p1498_p12 = scmp.ne.s32.totalorder %s1488_s20, 0 }
 0x1cd   : > { %p1499_p11 = scmp.ge.s32.totalorder %s1196_s14, 2  ;;  %s720_s6 = scalar_lea.sflag [#allocation4], %s719_s5 }
 0x1cf   : > { %p910_p0 = pnand %p1499_p11, %p1498_p12 }
 0x1d1   : > { %1171 = dma.done.wait (!%p910_p0), %s720_s6, 1152  }
 0x1d2   : > { %1173 = vsyncadd (!%p910_p0), %s720_s6, 4294966144  ;;  %s19_s14 = sadd.s32 1, %s1196_s14   ;;  %s1500_s9 = smov %s1180_s10 }
 0x1d3   : > { %p16_p5 = scmp.ge.s32.totalorder %s19_s14, 4   ;;  %s1501_s10 = smov %s1184_s11 }
 0x1d4   : > { %s1502_s11 = smov %s1328_s28  ;;  %s1503_s12 = smov %s1192_s13 }
 0x1d5   : > { %s1504_s13 = smov %s1506_s25  ;;  %18 = sbr.rel (!%p16_p5) target bundleno = 7 (0x7), region = 78 }
 0x1dc   :  { %725 = vsyncpa [#allocation3], 1 }
 0x1dd   :  { %727 = vsyncpa [#allocation3 + $0x1], 1 }
 0x1de   :  { %728 = vsyncpa [#allocation6], 1 }
 0x1df   :  { %729 = vsyncpa [#allocation4], 1 }
 0x1e0   :  { %731 = vsyncpa [#allocation4 + $0x1], 1 }

</bundles_post_ra>
